<compile_context>
chip_gen: v6e
topology: v6e:2x2x1
jax: 0.10.0
libtpu: 0.0.40
codegen_flags: <defaults>
</compile_context>

<pallas_src>
import functools

import jax
import jax.numpy as jnp
from jax.experimental import pallas as pl
from jax.experimental.pallas import tpu as pltpu


# ----------------------------------------------------------------------------
# Kernel
# ----------------------------------------------------------------------------

def _channel_attention_kernel(x_ref, w1_ref, w2_ref, o_ref,
                              sum_acc, max_acc, *, inv_hw):
    """Fused avg/max pool + shared 2-layer FC + add + sigmoid.

    x_ref  : (1, C, tile_hw)  float32   (HW on lanes — lane dense)
    w1_ref : (C, Hd)          fc1 weight, transposed from PyTorch (Hd, C)
    w2_ref : (C, Hd)          fc2 weight, PyTorch native (C, Hd)
    o_ref  : (1, C, 1)        per-batch channel gate
    sum_acc, max_acc : (C, 1) float32 VMEM scratch (cross-HW-tile accumulators)
    """
    hw_i = pl.program_id(1)

    # ---- init accumulators on the first HW tile -----------------------------
    @pl.when(hw_i == 0)
    def _():
        sum_acc[...] = jnp.zeros_like(sum_acc)
        max_acc[...] = jnp.full_like(max_acc, -jnp.inf)

    # ---- partial reductions over this HW tile (XLU lane reduce) -------------
    x = x_ref[0]                                                   # (C, tile_hw)
    sum_acc[...] += jnp.sum(x, axis=-1, keepdims=True)             # (C, 1)
    max_acc[...] = jnp.maximum(max_acc[...],
                               jnp.max(x, axis=-1, keepdims=True)) # (C, 1)

    # ---- finalize on the last HW tile: FC -> ReLU -> FC on both branches ----
    @pl.when(hw_i == pl.num_programs(1) - 1)
    def _():
        w1 = w1_ref[...]                                           # (C, Hd)
        w2 = w2_ref[...]                                           # (C, Hd)

        def mlp(p):                                                # p: (C, 1)
            # fc1: z[h] = sum_c p[c] * W1[h, c]   (VPU mul + sublane reduce)
            z = jnp.sum(p * w1, axis=0, keepdims=True)             # (1, Hd)
            z = jnp.maximum(z, 0.0)                                # ReLU
            # fc2: y[c] = sum_h z[h] * W2[c, h]   (VPU mul + lane reduce)
            return jnp.sum(w2 * z, axis=1, keepdims=True)          # (C, 1)

        avg = sum_acc[...] * inv_hw                                # mean pool
        y = mlp(avg) + mlp(max_acc[...])
        o_ref[...] = jax.nn.sigmoid(y)[None].astype(o_ref.dtype)   # (1, C, 1)


# ----------------------------------------------------------------------------
# pallas_call wrapper
# ----------------------------------------------------------------------------

def _pick_hw_tile(hw, max_tile=2048):
    """Largest HW tile <= max_tile; prefer multiples of 128 that divide HW."""
    if hw <= max_tile:
        return hw
    for t in range(max_tile, 0, -128):
        if hw % t == 0:
            return t
    return hw  # fallback: single full-extent tile


def channel_attention(x_nchw, w1, w2):
    """x_nchw: (B, C, H, W) f32 -> (B, C, 1, 1) sigmoid channel gate."""
    B, C, H, W = x_nchw.shape
    HW = H * W
    Hd = w1.shape[-1]
    x = x_nchw.reshape(B, C, HW)          # native memory order, HW on lanes

    tile_hw = _pick_hw_tile(HW)
    n_hw = HW // tile_hw

    kern = functools.partial(_channel_attention_kernel, inv_hw=1.0 / HW)
    out = pl.pallas_call(
        kern,
        out_shape=jax.ShapeDtypeStruct((B, C, 1), jnp.float32),
        grid_spec=pltpu.PrefetchScalarGridSpec(
            num_scalar_prefetch=0,
            grid=(B, n_hw),
            in_specs=[
                pl.BlockSpec((1, C, tile_hw), lambda b, t: (b, 0, t)),
                pl.BlockSpec((C, Hd), lambda b, t: (0, 0)),
                pl.BlockSpec((C, Hd), lambda b, t: (0, 0)),
            ],
            # same output block across the HW axis -> resident accumulator-style
            out_specs=pl.BlockSpec((1, C, 1), lambda b, t: (b, 0, 0)),
            scratch_shapes=[
                pltpu.VMEM((C, 1), jnp.float32),   # running sum
                pltpu.VMEM((C, 1), jnp.float32),   # running max
            ],
        ),
        compiler_params=pltpu.CompilerParams(
            dimension_semantics=("parallel", "arbitrary"),
        ),
    )(x, w1, w2)
    return out.reshape(B, C, 1, 1)


# ----------------------------------------------------------------------------
# Pure-JAX reference (for correctness check)
# ----------------------------------------------------------------------------

def channel_attention_ref(x, w1, w2):
    avg = jnp.mean(x, axis=(2, 3))                # (B, C)
    mx = jnp.max(x, axis=(2, 3))                  # (B, C)

    def mlp(p):
        z = jnp.maximum(p @ w1, 0.0)              # (B, Hd)
        return z @ w2.T                           # (B, C)

    y = jax.nn.sigmoid(mlp(avg) + mlp(mx))
    return y.reshape(*x.shape[:2], 1, 1)


# ----------------------------------------------------------------------------
if __name__ == "__main__":
    key = jax.random.PRNGKey(0)
    kx, k1, k2 = jax.random.split(key, 3)

    B, C, H, W = 2, 32, 16, 16
    ratio = 8
    Hd = C // ratio                               # = 4

    x = jax.random.normal(kx, (B, C, H, W), jnp.float32)
    # fc1.weight (Hd, C) stored transposed as (C, Hd); fc2.weight native (C, Hd)
    w1 = 0.1 * jax.random.normal(k1, (C, Hd), jnp.float32)
    w2 = 0.1 * jax.random.normal(k2, (C, Hd), jnp.float32)

    out = jax.jit(channel_attention)(x, w1, w2)
    jax.block_until_ready(out)
    assert out.shape == (B, C, 1, 1), out.shape

    ref = channel_attention_ref(x, w1, w2)
    err = float(jnp.max(jnp.abs(out - ref)))
    assert err < 1e-5, f"max abs err {err}"
    print("KERNEL_OK")
</pallas_src>

<mosaic_0001>
module attributes {stable_mosaic.version = 11 : i64} {
  func.func @_channel_attention_kernel(%arg0: i32, %arg1: i32, %arg2: memref<1x32x256xf32, #tpu.memory_space<vmem>>, %arg3: memref<32x4xf32, #tpu.memory_space<vmem>>, %arg4: memref<32x4xf32, #tpu.memory_space<vmem>>, %arg5: memref<1x32x1xf32, #tpu.memory_space<vmem>>, %arg6: memref<32x1xf32, #tpu.memory_space<vmem>>, %arg7: memref<32x1xf32, #tpu.memory_space<vmem>>) attributes {dimension_semantics = [#tpu.dimension_semantics<parallel>, #tpu.dimension_semantics<arbitrary>], iteration_bounds = array<i64: 2, 1>, scalar_prefetch = 0 : i64, scratch_operands = 2 : i64, tpu.core_type = #tpu.core_type<tc>, window_params = [{transform_indices = @transform_0, window_bounds = array<i64: 1, 32, 256>}, {pipeline_mode = #tpu.pipeline_mode<synchronous>, transform_indices = @transform_1, window_bounds = array<i64: 32, 4>}, {pipeline_mode = #tpu.pipeline_mode<synchronous>, transform_indices = @transform_2, window_bounds = array<i64: 32, 4>}, {transform_indices = @transform_3, window_bounds = array<i64: 1, 32, 1>}]} {
    %c0_i32 = arith.constant 0 : i32
    %0 = arith.cmpi eq, %arg1, %c0_i32 : i32
    %1 = arith.extui %0 : i1 to i32
    %c0_i32_0 = arith.constant 0 : i32
    %2 = arith.cmpi ne, %1, %c0_i32_0 : i32
    scf.if %2 {
      %cst_14 = arith.constant 0.000000e+00 : f32
      %18 = vector.broadcast %cst_14 : f32 to vector<32x1xf32>
      %c0_15 = arith.constant 0 : index
      %c0_16 = arith.constant 0 : index
      %19 = vector.load %arg6[%c0_15, %c0_16] : memref<32x1xf32, #tpu.memory_space<vmem>>, vector<32x1xf32>
      tpu.vector_store %arg6[%c0_15, %c0_16], %18 {strides = array<i32>} : memref<32x1xf32, #tpu.memory_space<vmem>>, vector<32x1xf32>,
      %cst_17 = arith.constant 0xFF800000 : f32
      %20 = vector.broadcast %cst_17 : f32 to vector<32x1xf32>
      %c0_18 = arith.constant 0 : index
      %c0_19 = arith.constant 0 : index
      %21 = vector.load %arg7[%c0_18, %c0_19] : memref<32x1xf32, #tpu.memory_space<vmem>>, vector<32x1xf32>
      tpu.vector_store %arg7[%c0_18, %c0_19], %20 {strides = array<i32>} : memref<32x1xf32, #tpu.memory_space<vmem>>, vector<32x1xf32>,
    } else {
    }
    %c0 = arith.constant 0 : index
    %c0_1 = arith.constant 0 : index
    %c0_2 = arith.constant 0 : index
    %3 = vector.load %arg2[%c0, %c0_1, %c0_2] : memref<1x32x256xf32, #tpu.memory_space<vmem>>, vector<1x32x256xf32>
    %4 = vector.shape_cast %3 : vector<1x32x256xf32> to vector<32x256xf32>
    %c0_3 = arith.constant 0 : index
    %c0_4 = arith.constant 0 : index
    %5 = vector.load %arg6[%c0_3, %c0_4] : memref<32x1xf32, #tpu.memory_space<vmem>>, vector<32x1xf32>
    %cst = arith.constant dense<0.000000e+00> : vector<32xf32>
    %6 = vector.multi_reduction <add>, %4, %cst [1] : vector<32x256xf32> to vector<32xf32>
    %7 = vector.shape_cast %6 : vector<32xf32> to vector<32x1xf32>
    %8 = arith.addf %5, %7 : vector<32x1xf32>
    %c0_5 = arith.constant 0 : index
    %c0_6 = arith.constant 0 : index
    %9 = vector.load %arg6[%c0_5, %c0_6] : memref<32x1xf32, #tpu.memory_space<vmem>>, vector<32x1xf32>
    tpu.vector_store %arg6[%c0_5, %c0_6], %8 {strides = array<i32>} : memref<32x1xf32, #tpu.memory_space<vmem>>, vector<32x1xf32>,
    %c0_7 = arith.constant 0 : index
    %c0_8 = arith.constant 0 : index
    %10 = vector.load %arg7[%c0_7, %c0_8] : memref<32x1xf32, #tpu.memory_space<vmem>>, vector<32x1xf32>
    %cst_9 = arith.constant dense<0xFF800000> : vector<32xf32>
    %11 = vector.multi_reduction <maximumf>, %4, %cst_9 [1] : vector<32x256xf32> to vector<32xf32>
    %12 = vector.shape_cast %11 : vector<32xf32> to vector<32x1xf32>
    %13 = arith.maximumf %10, %12 : vector<32x1xf32>
    %c0_10 = arith.constant 0 : index
    %c0_11 = arith.constant 0 : index
    %14 = vector.load %arg7[%c0_10, %c0_11] : memref<32x1xf32, #tpu.memory_space<vmem>>, vector<32x1xf32>
    tpu.vector_store %arg7[%c0_10, %c0_11], %13 {strides = array<i32>} : memref<32x1xf32, #tpu.memory_space<vmem>>, vector<32x1xf32>,
    %c0_i32_12 = arith.constant 0 : i32
    %15 = arith.cmpi eq, %arg1, %c0_i32_12 : i32
    %16 = arith.extui %15 : i1 to i32
    %c0_i32_13 = arith.constant 0 : i32
    %17 = arith.cmpi ne, %16, %c0_i32_13 : i32
    scf.if %17 {
      %c0_14 = arith.constant 0 : index
      %c0_15 = arith.constant 0 : index
      %18 = vector.load %arg3[%c0_14, %c0_15] : memref<32x4xf32, #tpu.memory_space<vmem>>, vector<32x4xf32>
      %c0_16 = arith.constant 0 : index
      %c0_17 = arith.constant 0 : index
      %19 = vector.load %arg4[%c0_16, %c0_17] : memref<32x4xf32, #tpu.memory_space<vmem>>, vector<32x4xf32>
      %c0_18 = arith.constant 0 : index
      %c0_19 = arith.constant 0 : index
      %20 = vector.load %arg6[%c0_18, %c0_19] : memref<32x1xf32, #tpu.memory_space<vmem>>, vector<32x1xf32>
      %cst_20 = arith.constant 3.906250e-03 : f32
      %21 = vector.broadcast %cst_20 : f32 to vector<32x1xf32>
      %22 = arith.mulf %20, %21 : vector<32x1xf32>
      %23 = vector.broadcast %22 : vector<32x1xf32> to vector<32x4xf32>
      %24 = arith.mulf %23, %18 : vector<32x4xf32>
      %cst_21 = arith.constant dense<0.000000e+00> : vector<4xf32>
      %25 = vector.multi_reduction <add>, %24, %cst_21 [0] : vector<32x4xf32> to vector<4xf32>
      %26 = vector.shape_cast %25 : vector<4xf32> to vector<1x4xf32>
      %cst_22 = arith.constant 0.000000e+00 : f32
      %27 = vector.broadcast %cst_22 : f32 to vector<1x4xf32>
      %28 = arith.maximumf %26, %27 : vector<1x4xf32>
      %29 = vector.broadcast %28 : vector<1x4xf32> to vector<32x4xf32>
      %30 = arith.mulf %19, %29 : vector<32x4xf32>
      %cst_23 = arith.constant dense<0.000000e+00> : vector<32xf32>
      %31 = vector.multi_reduction <add>, %30, %cst_23 [1] : vector<32x4xf32> to vector<32xf32>
      %32 = vector.shape_cast %31 : vector<32xf32> to vector<32x1xf32>
      %c0_24 = arith.constant 0 : index
      %c0_25 = arith.constant 0 : index
      %33 = vector.load %arg7[%c0_24, %c0_25] : memref<32x1xf32, #tpu.memory_space<vmem>>, vector<32x1xf32>
      %34 = vector.broadcast %33 : vector<32x1xf32> to vector<32x4xf32>
      %35 = arith.mulf %34, %18 : vector<32x4xf32>
      %cst_26 = arith.constant dense<0.000000e+00> : vector<4xf32>
      %36 = vector.multi_reduction <add>, %35, %cst_26 [0] : vector<32x4xf32> to vector<4xf32>
      %37 = vector.shape_cast %36 : vector<4xf32> to vector<1x4xf32>
      %cst_27 = arith.constant 0.000000e+00 : f32
      %38 = vector.broadcast %cst_27 : f32 to vector<1x4xf32>
      %39 = arith.maximumf %37, %38 : vector<1x4xf32>
      %40 = vector.broadcast %39 : vector<1x4xf32> to vector<32x4xf32>
      %41 = arith.mulf %19, %40 : vector<32x4xf32>
      %cst_28 = arith.constant dense<0.000000e+00> : vector<32xf32>
      %42 = vector.multi_reduction <add>, %41, %cst_28 [1] : vector<32x4xf32> to vector<32xf32>
      %43 = vector.shape_cast %42 : vector<32xf32> to vector<32x1xf32>
      %44 = arith.addf %32, %43 : vector<32x1xf32>
      %45 = arith.negf %44 : vector<32x1xf32>
      %46 = math.exp %45 : vector<32x1xf32>
      %cst_29 = arith.constant 1.000000e+00 : f32
      %47 = vector.broadcast %cst_29 : f32 to vector<32x1xf32>
      %48 = arith.addf %47, %46 : vector<32x1xf32>
      %49 = arith.divf %47, %48 : vector<32x1xf32>
      %50 = vector.shape_cast %49 : vector<32x1xf32> to vector<1x32x1xf32>
      %c0_30 = arith.constant 0 : index
      %c0_31 = arith.constant 0 : index
      %c0_32 = arith.constant 0 : index
      %51 = vector.load %arg5[%c0_30, %c0_31, %c0_32] : memref<1x32x1xf32, #tpu.memory_space<vmem>>, vector<1x32x1xf32>
      tpu.vector_store %arg5[%c0_30, %c0_31, %c0_32], %50 {strides = array<i32>} : memref<1x32x1xf32, #tpu.memory_space<vmem>>, vector<1x32x1xf32>,
    } else {
    }
    return
  }
  func.func @transform_0(%arg0: i32, %arg1: i32) -> (i32, i32, i32) {
    %c0_i32 = arith.constant 0 : i32
    %c0_i32_0 = arith.constant 0 : i32
    return %arg0, %c0_i32, %arg1 : i32, i32, i32
  }
  func.func @transform_1(%arg0: i32, %arg1: i32) -> (i32, i32) {
    %c0_i32 = arith.constant 0 : i32
    %c0_i32_0 = arith.constant 0 : i32
    %c0_i32_1 = arith.constant 0 : i32
    return %c0_i32, %c0_i32_0 : i32, i32
  }
  func.func @transform_2(%arg0: i32, %arg1: i32) -> (i32, i32) {
    %c0_i32 = arith.constant 0 : i32
    %c0_i32_0 = arith.constant 0 : i32
    %c0_i32_1 = arith.constant 0 : i32
    return %c0_i32, %c0_i32_0 : i32, i32
  }
  func.func @transform_3(%arg0: i32, %arg1: i32) -> (i32, i32, i32) {
    %c0_i32 = arith.constant 0 : i32
    %c0_i32_0 = arith.constant 0 : i32
    %c0_i32_1 = arith.constant 0 : i32
    return %arg0, %c0_i32, %c0_i32_0 : i32, i32, i32
  }
}

</mosaic_0001>

<bundles_post_ra>
// kernel: channel_attention.1
= control target key start
LH: loop header
LB: loop body
LE: loop exit
PB: predicated region body
PF: predicated region fallthrough
CT: control target
= control target key end

     0   :  { %s611_s12 = smov 0   ;;  %s613_s13 = smov 0   ;;  %s708_s0 = inlined_call_operand.vmem [shape: f32[2,32,256], index: 0, kind: input, shape index: {}]   ;;  %s709_s1 = inlined_call_operand.vmem [shape: f32[32,4], index: 1, kind: input, shape index: {}]   ;;  %s710_s2 = inlined_call_operand.vmem [shape: f32[32,4], index: 2, kind: input, shape index: {}]   ;;  %s711_s3 = inlined_call_operand.vmem [shape: f32[2,32,1], index: 3, kind: output, shape index: {}]  }
   0x1   :  { %s615_s14 = smov 0  }
   0x2 LB: > { %s25_s15 = sadd.s32 1, %s582_s13  ;;  %p506_p0 = scmp.ge.s32.totalorder %s586_s14, 1  ;;  %s586_s14 = sphi %s615_s14, %s13_s14   ;;  %s582_s13 = sphi %s613_s13, %s713_s13   ;;  %s578_s12 = sphi %s611_s12, %s712_s12  }
   0x3   : > { %p27_p1 = scmp.ge.s32.totalorder %s25_s15, 2  ;;  %p156_p2 = scmp.lt.s32.totalorder %s586_s14, 3 }
   0x5   : > { %s715_s15 = smov (%p27_p1, %s25_s15), 0  ;;  %p157_p3 = pnand %p506_p0, %p156_p2 }
   0x6   : > { %p185_p4 = scmp.lt.s32.totalorder (!%p157_p3), %s578_s12, 1 }
   0x7   : > { %160 = sbr.rel (%p157_p3) target bundleno = 527 (0x20f), region = 32 }
   0xc   : > { %vm203_vm0 = vcmask 7168   ;;  %v588_v0 = vmov 0.0   ;;  %s717_s12 = smov (!%p185_p4, %s578_s12), 1  ;;  %v589_v15 = vmov -inf   ;;  %v590_v18 = vmov 0   ;;  %v272_v58 = vld [vmem:[%s709_s1] sm:$0xff] }
   0xd   : > { %206 = vst.msk [vmem:[#allocation2 + $0x10] sm:$0xff] %vm203_vm0, %v588_v0  ;;  %204 = vst.msk [vmem:[#allocation2] sm:$0xff] %vm203_vm0, %v588_v0  ;;  %s517_s16 = sshll.u32 %s717_s12, 6  ;;  %546 = vset.pattern.permute.xlu0 %v590_v18  ;;  %547 = vset.pattern.permute.xlu1 %v590_v18  ;;  %v273_v60 = vld [vmem:[%s709_s1 + $0x8] sm:$0xff]  ;;  %vm312_vm1 = vcmask 31744   ;;  %s518_s9 = sshll.u32 %s717_s12, 5 }
   0xe   : > { %205 = vst.msk [vmem:[#allocation2 + $0x8] sm:$0xff] %vm203_vm0, %v588_v0  ;;  %207 = vst.msk [vmem:[#allocation2 + $0x18] sm:$0xff] %vm203_vm0, %v588_v0  ;;  %s192_s19 = scalar_lea.vmem %s708_s0, %s517_s16  ;;  %v274_v0 = vld [vmem:[%s709_s1 + $0x10] sm:$0xff]  ;;  %s198_s16 = scalar_lea.vmem %s711_s3, %s518_s9 }
   0xf   : > { %v216_v1 = vld [vmem:[%s192_s19 + $0x20] sm:$0xff]  ;;  %v217_v2 = vld [vmem:[%s192_s19 + $0x28] sm:$0xff]  ;;  %v214_v6 = vld [vmem:[%s192_s19 + $0x10] sm:$0xff]  ;;  %208 = vst.msk [vmem:[#allocation3] sm:$0xff] %vm203_vm0, %v589_v15 }
  0x10   : > { %v212_v3 = vld [vmem:[%s192_s19] sm:$0xff]  ;;  %v230_v4 = vadd.f32 %v217_v2, %v216_v1  ;;  %v213_v5 = vld [vmem:[%s192_s19 + $0x8] sm:$0xff]  ;;  %v215_v7 = vld [vmem:[%s192_s19 + $0x18] sm:$0xff]  ;;  %209 = vst.msk [vmem:[#allocation3 + $0x8] sm:$0xff] %vm203_vm0, %v589_v15  ;;  %v255_v17 = vmax.f32 %v216_v1, %v217_v2 }
  0x11   : > { %v224_v8 = vadd.f32 %v213_v5, %v212_v3  ;;  %v249_v9 = vmax.f32 %v212_v3, %v213_v5  ;;  %v227_v10 = vadd.f32 %v215_v7, %v214_v6  ;;  %v218_v11 = vld [vmem:[%s192_s19 + $0x30] sm:$0xff]  ;;  %v219_v12 = vld [vmem:[%s192_s19 + $0x38] sm:$0xff]  ;;  %v252_v14 = vmax.f32 %v214_v6, %v215_v7  ;;  %210 = vst.msk [vmem:[#allocation3 + $0x10] sm:$0xff] %vm203_vm0, %v589_v15 }
  0x12   : > { %231 = vadd.xlane.f32.xlu1 %v230_v4  ;;  %v233_v13 = vadd.f32 %v219_v12, %v218_v11  ;;  %211 = vst.msk [vmem:[#allocation3 + $0x18] sm:$0xff] %vm203_vm0, %v589_v15  ;;  %v258_v16 = vmax.f32 %v218_v11, %v219_v12  ;;  %v275_v5 = vld [vmem:[%s709_s1 + $0x18] sm:$0xff] }
  0x13   : > { %225 = vadd.xlane.f32.xlu0 %v224_v8 }
  0x14   : > { %v222_v19 = vld [vmem:[#allocation2 + $0x10] sm:$0xff]  ;;  %v220_v20 = vld [vmem:[#allocation2] sm:$0xff] }
  0x15   : > { %v221_v26 = vld [vmem:[#allocation2 + $0x8] sm:$0xff]  ;;  %v223_v31 = vld [vmem:[#allocation2 + $0x18] sm:$0xff] }
  0x16   : > { %250 = vmax.xlane.f32.xlu1 %v249_v9  ;;  %v245_v25 = vld [vmem:[#allocation3] sm:$0xff] }
  0x17   : > { %228 = vadd.xlane.f32.xlu0 %v227_v10  ;;  %v246_v32 = vld [vmem:[#allocation3 + $0x8] sm:$0xff] }
  0x18   : > { %v247_v38 = vld [vmem:[#allocation3 + $0x10] sm:$0xff] }
  0x19   : > { %v248_v37 = vld [vmem:[#allocation3 + $0x18] sm:$0xff] }
  0x1a   : > { %234 = vadd.xlane.f32.xlu1 %v233_v13 }
  0x1b   : > { %253 = vmax.xlane.f32.xlu0 %v252_v14 }
  0x1e   : > { %259 = vmax.xlane.f32.xlu1 %v258_v16 }
  0x1f   : > { %256 = vmax.xlane.f32.xlu0 %v255_v17 }
  0x9b   : > { %v232_v21 = vpop.xlane.xlu1 %231 }
  0x9c   : > { %v238_v22 = vadd.f32 %v232_v21, %v222_v19  ;;  %v226_v23 = vpop.xlane.xlu0 %225 }
  0x9d   : > { %v236_v24 = vadd.f32 %v226_v23, %v220_v20 }
  0x9e   : > { %243 = vst.msk [vmem:[#allocation2 + $0x10] sm:$0xff] %vm203_vm0, %v238_v22 }
  0x9f   : > { %241 = vst.msk [vmem:[#allocation2] sm:$0xff] %vm203_vm0, %v236_v24  ;;  %v251_v27 = vpop.xlane.xlu1 %250 }
  0xa0   : > { %v261_v28 = vmax.f32 %v245_v25, %v251_v27  ;;  %v229_v29 = vpop.xlane.xlu0 %228 }
  0xa1   : > { %v237_v30 = vadd.f32 %v229_v29, %v221_v26 }
  0xa2   : > { %265 = vst.msk [vmem:[#allocation3] sm:$0xff] %vm203_vm0, %v261_v28 }
  0xa3   : > { %242 = vst.msk [vmem:[#allocation2 + $0x8] sm:$0xff] %vm203_vm0, %v237_v30  ;;  %v235_v33 = vpop.xlane.xlu1 %234 }
  0xa4   : > { %v254_v34 = vpop.xlane.xlu0 %253  ;;  %v239_v35 = vadd.f32 %v235_v33, %v223_v31 }
  0xa5   : > { %v262_v36 = vmax.f32 %v246_v32, %v254_v34  ;;  %v282_v50 = vld [vmem:[#allocation2 + $0x10] sm:$0xff] }
  0xa6   : > { %v280_v39 = vld [vmem:[#allocation2] sm:$0xff]  ;;  %244 = vst.msk [vmem:[#allocation2 + $0x18] sm:$0xff] %vm203_vm0, %v239_v35  ;;  %v286_v52 = vmul.f32 0.00390625, %v282_v50 }
  0xa7   : > { %266 = vst.msk [vmem:[#allocation3 + $0x8] sm:$0xff] %vm203_vm0, %v262_v36  ;;  %v284_v40 = vmul.f32 0.00390625, %v280_v39  ;;  %v260_v41 = vpop.xlane.xlu1 %259  ;;  %v277_v39 = vld [vmem:[%s710_s2 + $0x8] sm:$0xff] }
  0xa8   : > { %v257_v42 = vpop.xlane.xlu0 %256  ;;  %v264_v43 = vmax.f32 %v248_v37, %v260_v41 }
  0xa9   : > { %v263_v44 = vmax.f32 %v247_v38, %v257_v42  ;;  %290 = vperm.xlu0 %546, %v284_v40   ;;  %v343_v45 = vld [vmem:[#allocation3] sm:$0xff] }
  0xaa   : > { %349 = vperm.xlu1 %547, %v343_v45   ;;  %268 = vst.msk [vmem:[#allocation3 + $0x18] sm:$0xff] %vm203_vm0, %v264_v43  ;;  %v281_v48 = vld [vmem:[#allocation2 + $0x8] sm:$0xff]  ;;  %v276_v40 = vld [vmem:[%s710_s2] sm:$0xff] }
  0xab   : > { %267 = vst.msk [vmem:[#allocation3 + $0x10] sm:$0xff] %vm203_vm0, %v263_v44  ;;  %v285_v49 = vmul.f32 0.00390625, %v281_v48  ;;  %v279_v48 = vld [vmem:[%s710_s2 + $0x18] sm:$0xff] }
  0xad   : > { %v283_v51 = vld [vmem:[#allocation2 + $0x18] sm:$0xff] }
  0xae   : > { %v344_v46 = vld [vmem:[#allocation3 + $0x8] sm:$0xff]  ;;  %v287_v53 = vmul.f32 0.00390625, %v283_v51 }
  0xaf   : > { %354 = vperm.xlu1 %547, %v344_v46  }
  0xb1   : > { %v346_v54 = vld [vmem:[#allocation3 + $0x18] sm:$0xff] }
  0xb2   : > { %v345_v47 = vld [vmem:[#allocation3 + $0x10] sm:$0xff] }
  0xb3   : > { %359 = vperm.xlu1 %547, %v345_v47   ;;  %v278_v47 = vld [vmem:[%s710_s2 + $0x10] sm:$0xff] }
  0xb7   : > { %295 = vperm.xlu1 %547, %v285_v49  }
  0xbb   : > { %300 = vperm.xlu1 %547, %v286_v52  }
  0xbf   : > { %305 = vperm.xlu1 %547, %v287_v53  }
  0xc3   : > { %364 = vperm.xlu1 %547, %v346_v54  }
 0x124   : > { %v291_v59 = vpop.permute.xlu0 %290 }
 0x125   : > { %v350_v55 = vpop.permute.xlu1 %349  ;;  %v308_v63 = vmul.f32 %v291_v59, %v272_v58 }
 0x126   : > { %v367_v7 = vmul.f32 %v350_v55, %v272_v58 }
 0x127   : > { %v313_v6 = vsel %vm312_vm1, %v308_v63, 0.0 }
 0x128   : > { %v371_v15 = vsel %vm312_vm1, %v367_v7, 0.0 }
 0x12a   : > { %v355_v56 = vpop.permute.xlu1 %354 }
 0x12b   : > { %v368_v2 = vmul.f32 %v355_v56, %v273_v60 }
 0x12d   : > { %v372_v12 = vsel %vm312_vm1, %v368_v2, 0.0 }
 0x12e   : > { %v360_v57 = vpop.permute.xlu1 %359  ;;  %v373_v18 = vadd.f32 %v372_v12, %v371_v15 }
 0x12f   : > { %v369_v8 = vmul.f32 %v360_v57, %v274_v0 }
 0x131   : > { %v374_v16 = vsel %vm312_vm1, %v369_v8, 0.0 }
 0x132   : > { %v296_v61 = vpop.permute.xlu1 %295  ;;  %v375_v22 = vadd.f32 %v374_v16, %v373_v18 }
 0x133   : > { %v309_v62 = vmul.f32 %v296_v61, %v273_v60 }
 0x135   : > { %v314_v3 = vsel %vm312_vm1, %v309_v62, 0.0 }
 0x136   : > { %v301_v1 = vpop.permute.xlu1 %300  ;;  %v315_v10 = vadd.f32 %v314_v3, %v313_v6 }
 0x137   : > { %v310_v4 = vmul.f32 %v301_v1, %v274_v0 }
 0x139   : > { %v316_v9 = vsel %vm312_vm1, %v310_v4, 0.0 }
 0x13a   : > { %v306_v11 = vpop.permute.xlu1 %305  ;;  %v317_v14 = vadd.f32 %v316_v9, %v315_v10 }
 0x13b   : > { %v311_v13 = vmul.f32 %v306_v11, %v275_v5 }
 0x13d   : > { %v318_v17 = vsel %vm312_vm1, %v311_v13, 0.0 }
 0x13e   : > { %v319_v19 = vadd.f32 %v318_v17, %v317_v14  ;;  %v365_v20 = vpop.permute.xlu1 %364 }
 0x13f   : > { %v370_v21 = vmul.f32 %v365_v20, %v275_v5 }
 0x140   : > { %v320_v23 = vrot.slane %v319_v19, 4 }
 0x141   : > { %v376_v24 = vsel %vm312_vm1, %v370_v21, 0.0 }
 0x142   : > { %v321_v25 = vadd.f32 %v320_v23, %v319_v19  ;;  %v377_v26 = vadd.f32 %v376_v24, %v375_v22 }
 0x144   : > { %v322_v27 = vrot.slane %v321_v25, 2  ;;  %v378_v28 = vrot.slane %v377_v26, 4 }
 0x146   : > { %v323_v29 = vadd.f32 %v322_v27, %v321_v25  ;;  %v379_v30 = vadd.f32 %v378_v28, %v377_v26 }
 0x148   : > { %v324_v31 = vrot.slane %v323_v29, 1  ;;  %v380_v32 = vrot.slane %v379_v30, 2 }
 0x14a   : > { %v381_v33 = vadd.f32 %v380_v32, %v379_v30  ;;  %v325_v34 = vadd.f32 %v324_v31, %v323_v29 }
 0x14c   : > { %v382_v35 = vrot.slane %v381_v33, 1  ;;  %v326_v37 = vmax.f32 %v325_v34, 0.0 }
 0x14e   : > { %v383_v36 = vadd.f32 %v382_v35, %v381_v33  ;;  %v328_v45 = vmul.f32 %v326_v37, %v277_v39  ;;  %v327_v46 = vmul.f32 %v326_v37, %v276_v40  ;;  %v329_v51 = vmul.f32 %v326_v37, %v278_v47 }
 0x14f   : > { %v330_v52 = vmul.f32 %v326_v37, %v279_v48 }
 0x150   : > { %v384_v38 = vmax.f32 %v383_v36, 0.0  ;;  %v334_v49 = vsel %vm312_vm1, %v328_v45, 0.0  ;;  %v331_v50 = vsel %vm312_vm1, %v327_v46, 0.0  ;;  %v337_v53 = vsel %vm312_vm1, %v329_v51, 0.0 }
 0x151   : > { %v340_v54 = vsel %vm312_vm1, %v330_v52, 0.0 }
 0x152   : > { %v386_v41 = vmul.f32 %v384_v38, %v277_v39  ;;  %v385_v42 = vmul.f32 %v384_v38, %v276_v40  ;;  %v387_v55 = vmul.f32 %v384_v38, %v278_v47  ;;  %v388_v56 = vmul.f32 %v384_v38, %v279_v48 }
 0x154   : > { %v392_v43 = vsel %vm312_vm1, %v386_v41, 0.0  ;;  %v389_v44 = vsel %vm312_vm1, %v385_v42, 0.0  ;;  %v395_v57 = vsel %vm312_vm1, %v387_v55, 0.0  ;;  %v398_v58 = vsel %vm312_vm1, %v388_v56, 0.0 }
 0x155   : > { %393 = vadd.xlane.f32.xlu1 %v392_v43  ;;  %390 = vadd.xlane.f32.xlu0 %v389_v44 }
 0x159   : > { %335 = vadd.xlane.f32.xlu0 %v334_v49  ;;  %332 = vadd.xlane.f32.xlu1 %v331_v50 }
 0x15d   : > { %338 = vadd.xlane.f32.xlu0 %v337_v53  ;;  %341 = vadd.xlane.f32.xlu1 %v340_v54 }
 0x161   : > { %396 = vadd.xlane.f32.xlu0 %v395_v57  ;;  %399 = vadd.xlane.f32.xlu1 %v398_v58 }
 0x1de   : > { %v394_v59 = vpop.xlane.xlu1 %393  ;;  %v391_v60 = vpop.xlane.xlu0 %390 }
 0x1e2   : > { %v333_v61 = vpop.xlane.xlu1 %332  ;;  %v336_v62 = vpop.xlane.xlu0 %335 }
 0x1e3   : > { %v401_v63 = vadd.f32 %v391_v60, %v333_v61  ;;  %v402_v0 = vadd.f32 %v394_v59, %v336_v62 }
 0x1e5   : > { %v511_v1 = vmul.f32 -1.442695, %v401_v63  ;;  %v512_v2 = vmul.f32 -1.442695, %v402_v0 }
 0x1e6   : > { %v342_v3 = vpop.xlane.xlu1 %341  ;;  %v339_v4 = vpop.xlane.xlu0 %338 }
 0x1e7   : > { %548 = vpow2.f32 %v511_v1 }
 0x1e8   : > { %550 = vpow2.f32 %v512_v2 }
 0x1ea   : > { %v400_v5 = vpop.xlane.xlu1 %399  ;;  %v397_v6 = vpop.xlane.xlu0 %396 }
 0x1eb   : > { %v404_v7 = vadd.f32 %v400_v5, %v342_v3  ;;  %v403_v8 = vadd.f32 %v397_v6, %v339_v4 }
 0x1ed   : > { %v514_v9 = vmul.f32 -1.442695, %v404_v7  ;;  %v513_v10 = vmul.f32 -1.442695, %v403_v8 }
 0x1ef   : > { %552 = vpow2.f32 %v514_v9 }
 0x1f0   : > { %554 = vpow2.f32 %v513_v10 }
 0x1f4   : > { %v549_v11 = vpop.eup %548 }
 0x1f5   : > { %v551_v12 = vpop.eup %550  ;;  %v417_v13 = vadd.f32 1.0, %v549_v11 }
 0x1f6   : > { %v418_v14 = vadd.f32 1.0, %v551_v12 }
 0x1f7   : > { %556 = vrcp.f32 %v417_v13 }
 0x1f8   : > { %558 = vrcp.f32 %v418_v14 }
 0x1fc   : > { %v553_v15 = vpop.eup %552 }
 0x1fd   : > { %v555_v16 = vpop.eup %554  ;;  %v420_v17 = vadd.f32 1.0, %v553_v15 }
 0x1fe   : > { %v419_v18 = vadd.f32 1.0, %v555_v16 }
 0x1ff   : > { %560 = vrcp.f32 %v420_v17 }
 0x200   : > { %562 = vrcp.f32 %v419_v18 }
 0x204   : > { %v557_v19 = vpop.eup %556 }
 0x205   : > { %v559_v20 = vpop.eup %558  ;;  %429 = vst.msk [vmem:[%s198_s16] sm:$0xff] %vm203_vm0, %v557_v19 }
 0x206   : > { %430 = vst.msk [vmem:[%s198_s16 + $0x8] sm:$0xff] %vm203_vm0, %v559_v20 }
 0x20c   : > { %v561_v21 = vpop.eup %560 }
 0x20d   : > { %v563_v22 = vpop.eup %562  ;;  %432 = vst.msk [vmem:[%s198_s16 + $0x18] sm:$0xff] %vm203_vm0, %v561_v21 }
 0x20e   : > { %431 = vst.msk [vmem:[%s198_s16 + $0x10] sm:$0xff] %vm203_vm0, %v563_v22 }
 0x20f PF: > { %s13_s14 = sadd.s32 1, %s586_s14   ;;  %s712_s12 = smov %s582_s13 }
 0x210   : > { %p10_p5 = scmp.ge.s32.totalorder %s13_s14, 4   ;;  %s713_s13 = smov %s715_s15 }
 0x212   :  { %12 = sbr.rel (!%p10_p5) target bundleno = 2 (0x2), region = 70 }

</bundles_post_ra>
